<compile_context>
chip_gen: v7x
topology: tpu7x:2x2x1
jax: 0.10.0
libtpu: 0.0.40
codegen_flags: <defaults>
</compile_context>

<pallas_src>
import functools
import math

import numpy as np
import jax
import jax.numpy as jnp
from jax import lax
from jax.experimental import pallas as pl
from jax.experimental.pallas import tpu as pltpu

# Neighbor offsets in the same order as get_kernel(): kernel index k hits padded
# pixel (ky, kx) -> offset (ky-1, kx-1):
_OFFSETS = [(-1, -1), (-1, 0), (-1, 1), (0, -1), (0, 1), (1, -1), (1, 0), (1, 1)]

W1 = 0.3
W2 = 0.01


def _pos_softmax(dilations, w1=W1):
    """AFF.get_pos + softmax(pos_aff, dim=2): data-independent per-k constants."""
    base = np.ones(8, dtype=np.float64)
    for i in (0, 2, 5, 7):                       # diagonal neighbors
        base[i] = math.sqrt(2.0)
    pos = np.concatenate([base * d for d in dilations])          # (K,)
    pos_std = pos.std(ddof=1)                                    # torch.std (unbiased)
    logits = -((pos / (pos_std + 1e-8) / w1) ** 2)
    e = np.exp(logits - logits.max())
    return (e / e.sum()).astype(np.float32)


@functools.lru_cache(maxsize=None)
def _roll_sign():
    """Sign s such that pltpu.roll(x, (s*k) % n, axis=-1)[p] == x[(p + k) % n].

    Probed once with a tiny pallas_call so the shift code is robust to either
    roll convention; the convention is identical in compiled and interpret mode.
    """
    def k(x_ref, o_ref):
        o_ref[...] = pltpu.roll(x_ref[...], 1, axis=1)
    x = jnp.arange(256, dtype=jnp.int32).reshape(1, 256)
    y = np.asarray(pl.pallas_call(
        k, out_shape=jax.ShapeDtypeStruct((1, 256), jnp.int32))(x))
    return -1 if int(y[0, 0]) == 255 else 1      # -1 <=> np.roll convention


def _aff_kernel(imgs_ref, masks_ref, out_ref, aff_scr, nbr_scr, *,
                dilations, num_iter, w1, w2, h, w, pos_soft, roll_sign):
    n = h * w
    offsets = [(dy * d, dx * d) for d in dilations for (dy, dx) in _OFFSETS]
    K = len(offsets)

    x = imgs_ref[0].astype(jnp.float32)          # (C,  N) lane-dense
    cur = masks_ref[0].astype(jnp.float32)       # (CM, N)
    c = x.shape[0]

    # ---- per-lane (row, col) from a 2-D iota: no extra input, no integer div ----
    lane = lax.broadcasted_iota(jnp.int32, (1, n), 1)
    # exact floor(lane / w) for n < 2^22 (float trick avoids vector integer div)
    row = jnp.floor((lane.astype(jnp.float32) + 0.5) * (1.0 / w)).astype(jnp.int32)
    col = lane - row * w

    # ---- hoisted clamp-select masks: depend only on (axis, delta), reused by all gathers ----
    col_deltas = sorted({dx for (_, dx) in offsets})
    row_deltas = sorted({dy for (dy, _) in offsets})

    def clamp_masks(idx, size, deltas):
        m = {}
        for d in deltas:
            if d == 0:
                continue
            amt = jnp.clip(idx + d, 0, size - 1) - idx            # (1, N) int32
            step = 1 if d > 0 else -1
            m[d] = [(a, amt == a) for a in range(0, d, step)]     # edge-case masks
        return m

    col_masks = clamp_masks(col, w, col_deltas)
    row_masks = clamp_masks(row, h, row_deltas)

    def shift(src, delta, stride, masks, memo):
        """Replicate-clamped shift along the flattened (lane) axis; rolls memoized."""
        if delta == 0:
            return src

        def rolled(a):
            if a == 0:
                return src
            if a not in memo:
                memo[a] = pltpu.roll(src, (roll_sign * a * stride) % n, axis=1)
            return memo[a]

        out = rolled(delta)                       # interior (unclamped) case
        for a, msk in masks[delta]:               # clamped (edge) cases
            out = jnp.where(msk, rolled(a), out)
        return out

    # offsets grouped by dx so the row-roll memo is shared within each group
    by_dx = {}
    for k, (dy, dx) in enumerate(offsets):
        by_dx.setdefault(dx, []).append((k, dy))

    def col_shifts(src):
        memo = {}
        return {dx: shift(src, dx, 1, col_masks, memo) for dx in col_deltas}

    def gather_mac(csh, consume):
        """Generate each replicate-padded dilated-3x3 neighbor and consume it immediately."""
        for dx, items in by_dx.items():
            memo = {}
            base = csh[dx]
            for k, dy in items:
                consume(k, shift(base, dy, w, row_masks, memo))

    # ---- pass A over image neighbors: streaming sum / sum-of-squares ----
    # Each neighbor is also stashed to VMEM scratch so pass B needs no re-gather
    # and never holds more than one neighbor in registers.
    stats = {}

    def stash_and_stats(k, nb):
        nbr_scr[k] = nb
        if not stats:
            stats['s1'], stats['s2'] = nb, nb * nb
        else:
            stats['s1'], stats['s2'] = stats['s1'] + nb, stats['s2'] + nb * nb

    gather_mac(col_shifts(x), stash_and_stats)
    s1, s2 = stats['s1'], stats['s2']
    mean = s1 * (1.0 / K)
    var = jnp.maximum((s2 - s1 * mean) * (1.0 / (K - 1)), 0.0)   # unbiased (ddof=1)
    std = jnp.sqrt(var)
    inv = 1.0 / ((std + 1e-8) * w1)              # exact; matches torch eps exactly

    # ---- pass B: per-neighbor logits (mean over channels) -> scratch rows ----
    for k in range(K):
        t = (nbr_scr[k] - x) * inv
        aff_scr[k:k + 1, :] = -(jnp.sum(t * t, axis=0, keepdims=True) * (1.0 / c))

    # ---- softmax over neighbors (exact arithmetic, no approx reciprocal) ----
    logits = aff_scr[...]                                        # (K, N)
    mmax = jnp.max(logits, axis=0, keepdims=True)
    e = jnp.exp(logits - mmax)
    inv_den = 1.0 / jnp.sum(e, axis=0, keepdims=True)
    aff_scr[...] = e * inv_den                                   # scratch = softmax(aff)

    # ---- propagation: masks <- sum_k (softmax_k + w2*pos_k) * neighbor_k(masks) ----
    # aff rows are re-loaded from VMEM per use (sublane broadcast in the multiply);
    # the data-independent w2*softmax(pos) term is a per-k scalar constant.
    pos_const = [w2 * float(pos_soft[k]) for k in range(K)]
    for _ in range(num_iter):
        acc = {}

        def mac(k, nb):
            contrib = (aff_scr[k:k + 1, :] + pos_const[k]) * nb
            acc['v'] = contrib if 'v' not in acc else acc['v'] + contrib

        gather_mac(col_shifts(cur), mac)
        cur = acc['v']

    out_ref[0] = cur.astype(out_ref.dtype)


def aff_forward(imgs, masks, dilations=(1, 2), num_iter=2, w1=W1, w2=W2):
    b, c, h, w = imgs.shape
    cm = masks.shape[1]
    n = h * w
    K = 8 * len(dilations)
    pos_soft = tuple(float(v) for v in _pos_softmax(dilations, w1))
    roll_sign = _roll_sign()

    kernel = functools.partial(
        _aff_kernel, dilations=tuple(int(d) for d in dilations),
        num_iter=int(num_iter), w1=float(w1), w2=float(w2),
        h=h, w=w, pos_soft=pos_soft, roll_sign=roll_sign)

    # One image per grid step, batch axis "parallel" (both v7x TensorCores busy
    # at B=2).  At 16x16 everything fits trivially in VMEM; the scratch buffers
    # (K x N affinities + K x C x N image neighbors) total < 0.2 MiB.
    out = pl.pallas_call(
        kernel,
        out_shape=jax.ShapeDtypeStruct((b, cm, n), jnp.float32),
        grid=(b,),
        in_specs=[
            pl.BlockSpec((1, c, n), lambda i: (i, 0, 0)),
            pl.BlockSpec((1, cm, n), lambda i: (i, 0, 0)),
        ],
        out_specs=pl.BlockSpec((1, cm, n), lambda i: (i, 0, 0)),
        scratch_shapes=[
            pltpu.VMEM((K, n), jnp.float32),        # logits -> softmax(aff) rows
            pltpu.VMEM((K, c, n), jnp.float32),     # stashed image neighbors
        ],
        compiler_params=pltpu.CompilerParams(dimension_semantics=("parallel",)),
    )(imgs.reshape(b, c, n), masks.reshape(b, cm, n))
    return out.reshape(b, cm, h, w)


# ----------------------------- pure-JAX reference -----------------------------
def aff_forward_ref(imgs, masks, dilations=(1, 2), num_iter=2, w1=W1, w2=W2):
    b, c, h, w = imgs.shape
    dmax = max(dilations)

    def neighbors(x):
        xp = jnp.pad(x, ((0, 0), (0, 0), (dmax, dmax), (dmax, dmax)), mode="edge")
        outs = []
        for d in dilations:
            for (dy, dx) in _OFFSETS:
                outs.append(xp[:, :, dmax + dy * d:dmax + dy * d + h,
                                dmax + dx * d:dmax + dx * d + w])
        return jnp.stack(outs, axis=2)                           # (b, c, K, h, w)

    _imgs = neighbors(imgs)
    _imgs_abs = jnp.abs(_imgs - imgs[:, :, None])
    _imgs_std = jnp.std(_imgs, axis=2, keepdims=True, ddof=1)
    aff = -((_imgs_abs / (_imgs_std + 1e-8) / w1) ** 2).mean(axis=1, keepdims=True)
    pos_soft = jnp.asarray(_pos_softmax(dilations, w1))
    aff = jax.nn.softmax(aff, axis=2) + w2 * pos_soft[None, None, :, None, None]
    for _ in range(num_iter):
        _masks = neighbors(masks)
        masks = (_masks * aff).sum(axis=2)
    return masks


if __name__ == "__main__":
    B, C, H, W = 2, 4, 16, 16
    CM = 3                       # mask channels
    dilations = (1, 2)           # K = 16 neighbors
    num_iter = 2

    key = jax.random.PRNGKey(0)
    k1, k2 = jax.random.split(key)
    imgs = jax.random.normal(k1, (B, C, H, W), dtype=jnp.float32)
    masks = jax.nn.softmax(jax.random.normal(k2, (B, CM, H, W), dtype=jnp.float32), axis=1)

    out = jax.block_until_ready(aff_forward(imgs, masks, dilations, num_iter))
    assert out.shape == (B, CM, H, W)

    ref = jax.block_until_ready(aff_forward_ref(imgs, masks, dilations, num_iter))
    np.testing.assert_allclose(np.asarray(out), np.asarray(ref), rtol=2e-3, atol=1e-4)

    print("KERNEL_OK")
</pallas_src>

<mosaic_0001>
module attributes {stable_mosaic.version = 11 : i64} {
  func.func @k(%arg0: memref<1x256xi32, #tpu.memory_space<vmem>>, %arg1: memref<1x256xi32, #tpu.memory_space<vmem>>) attributes {dimension_semantics = [], scalar_prefetch = 0 : i64, scratch_operands = 0 : i64, tpu.core_type = #tpu.core_type<tc>} {
    %c0 = arith.constant 0 : index
    %c0_0 = arith.constant 0 : index
    %0 = vector.load %arg0[%c0, %c0_0] : memref<1x256xi32, #tpu.memory_space<vmem>>, vector<1x256xi32>
    %c1_i32 = arith.constant 1 : i32
    %1 = tpu.dynamic_rotate %0 by %c1_i32 dim 1 : vector<1x256xi32>, i32 -> vector<1x256xi32>
    %c0_1 = arith.constant 0 : index
    %c0_2 = arith.constant 0 : index
    %2 = vector.load %arg1[%c0_1, %c0_2] : memref<1x256xi32, #tpu.memory_space<vmem>>, vector<1x256xi32>
    tpu.vector_store %arg1[%c0_1, %c0_2], %1 {strides = array<i32>} : memref<1x256xi32, #tpu.memory_space<vmem>>, vector<1x256xi32>,
    return
  }
}

</mosaic_0001>

<bundles_post_ra>
// kernel: tpu_custom_call.1
= control target key start
LH: loop header
LB: loop body
LE: loop exit
PB: predicated region body
PF: predicated region fallthrough
CT: control target
= control target key end

     0   :  { %6 = vsyncpa [#allocation3], 0  ;;  %s164_s0 = inlined_call_operand.hbm [shape: s32[1,256], index: 0, kind: input, shape index: {}]   ;;  %s165_s1 = inlined_call_operand.hbm [shape: s32[1,256], index: 1, kind: output, shape index: {}]  }
   0x1   :  { %7 = vsyncpa [#allocation4], 0  ;;  %s126_s6 = smov [#allocation2]   ;;  %s78_s10 = scalar_lea.hbm %s164_s0, 32 }
   0x2   :  { %s14_s7 = sshll.u32 %s126_s6, 4  ;;  %p79_p0 = scmp.ne.s32.totalorder %s164_s0, %s78_s10  ;;  %s15_s7 = int_to_ptr.vmem [resolvable:$true] %s14_s7 }
   0x3   :  { %p82_p1 = scmp.lt.u32.totalorder %s78_s10, %s164_s0 }
   0x5   :  { %p84_p2 = pnand %p82_p1, %p79_p0 }
   0x7   :  { %87 = shalt.err (!%p84_p2)
}
   0x8   :  { %s88_s15 = scalar_lea.vmem %s15_s7, 32  ;;  %p93_p4 = scmp.lt.s32.totalorder %s15_s7, %s15_s7 }
   0x9   :  { %p89_p3 = scmp.ne.s32.totalorder %s15_s7, %s88_s15  ;;  %p94_p5 = scmp.lt.s32.totalorder %s88_s15, %s88_s15 }
   0xb   :  { %p95_p6 = por %p94_p5, %p93_p4 }
   0xd   :  { %p96_p7 = pnand %p95_p6, %p89_p3 }
   0xf   :  { %99 = shalt.err (!%p96_p7)
}
  0x10   :  { %17 = dma.hbm_to_vmem [thread:$0]  %s164_s0, 32, %s15_s7, [#allocation3]  }
  0x11   :  { %122 = dma.done.wait [#allocation3], 32  }
  0x12   :  { %123 = vsyncadd [#allocation3], 4294967264  ;;  %v22_v0 = vlaneseq  ;;  %v21_v4 = vld [vmem:[#allocation2] sm:$0x3]  ;;  %s127_s18 = smov 1   ;;  %s129_s0 = smov [#allocation5]  }
  0x13   :  { %v128_v7 = vmov 1966171168   ;;  %s65_s19 = sshll.u32 %s129_s0, 4  ;;  %s66_s19 = int_to_ptr.vmem [resolvable:$true] %s65_s19 }
  0x14   :  { %v23_v1 = vshrl.u32 %v22_v0, 7  ;;  %v41_v8 = vunpack.c.l.s4 %v128_v7  ;;  %v35_v9 = vand.u32 127, %v22_v0  ;;  %vm56_vm1 = vcmp.lt.s32.totalorder %v22_v0, 256  ;;  %s100_s20 = scalar_lea.vmem %s66_s19, 32  ;;  %p105_p9 = scmp.lt.s32.totalorder %s66_s19, %s66_s19 }
  0x15   :  { %p101_p8 = scmp.ne.s32.totalorder %s66_s19, %s100_s20  ;;  %p106_p10 = scmp.lt.s32.totalorder %s100_s20, %s100_s20 }
  0x16   :  { %v24_v2 = vsub.s32 0, %v23_v1  ;;  %v28_v3 = vsub.s32 1, %v23_v1  ;;  %v42_v11 = vunpack.c.0.s8 %v41_v8  ;;  %vm36_vm0 = vcmp.lt.s32.totalorder %v35_v9, 1 }
  0x17   :  { %p107_p11 = por %p106_p10, %p105_p9 }
  0x18   :  { %v25_v5 = vrot.slane %v21_v4, %v24_v2  ;;  %v29_v6 = vrot.slane %v21_v4, %v28_v3  ;;  %v45_v12 = vsub.s32 %v42_v11, %v23_v1 }
  0x19   :  { %p108_p12 = pnand %p107_p11, %p101_p8 }
  0x1a   :  { %30 = vrot.lane.b32.xlu0 %v25_v5, %s127_s18 }
  0x1e   :  { %32 = vrot.lane.b32.xlu0 %v29_v6, %s127_s18 }
  0x8c   :  { %v31_v10 = vpop.permute.xlu0 %30 }
  0x90   :  { %v33_v13 = vpop.permute.xlu0 %32 }
  0x91   :  { %v37_v14 = vsel %vm36_vm0, %v31_v10, %v33_v13  ;;  %v38_v15 = vsel %vm36_vm0, %v33_v13, %v31_v10 }
  0x92   :  { %v39_v16 = vcombine.low %v38_v15, %v37_v14 }
  0x94   :  { %v46_v17 = vrot.slane %v39_v16, %v45_v12 }
  0x96   :  { %v53_v18 = vrot.slane %v46_v17, %v45_v12 }
  0x98   :  { %58 = vst.msk [vmem:[#allocation5] sm:$0x3] %vm56_vm1, %v53_v18 }
  0x99   :  { %111 = shalt.err (!%p108_p12)
}
  0x9a   :  { %s112_s23 = scalar_lea.hbm %s165_s1, 32 }
  0x9b   :  { %p113_p13 = scmp.ne.s32.totalorder %s165_s1, %s112_s23  ;;  %p116_p0 = scmp.lt.u32.totalorder %s112_s23, %s165_s1 }
  0x9d   :  { %p118_p1 = pnand %p116_p0, %p113_p13 }
  0x9f   :  { %121 = shalt.err (!%p118_p1)
}
  0xa0   :  { %68 = dma.vmem_to_hbm [thread:$0]  %s66_s19, 32, %s165_s1, [#allocation4]  }
  0xa1   :  { %124 = dma.done.wait [#allocation4], 32  }
  0xa2   :  { %125 = vsyncadd [#allocation4], 4294967264 }
  0xa3   :  { %72 = vsyncpa [#allocation3], 1 }
  0xa4   :  { %73 = vsyncpa [#allocation4], 1 }

</bundles_post_ra>
